<compile_context>
chip_gen: v7x
topology: tpu7x:2x2x1
jax: 0.10.0
libtpu: 0.0.40
codegen_flags: <defaults>
</compile_context>

<pallas_src>
import jax
import jax.numpy as jnp
from jax.experimental import pallas as pl
from jax.experimental.pallas import tpu as pltpu


def _round_up(x, m):
    return ((x + m - 1) // m) * m


def _embedding_mlp_kernel(x_ref, w1_ref, b1_ref, w2_ref, b2_ref, o_ref):
    """out = relu(x @ W1 + b1) @ W2 + b2, single resident (M, E) slab."""
    # First matmul: bf16 x bf16 -> f32 accumulate on the MXU.
    h = jnp.dot(x_ref[...], w1_ref[...],
                preferred_element_type=jnp.float32) + b1_ref[...]
    h = jnp.maximum(h, 0.0)                                    # ReLU in f32
    # Second matmul: cast the activation back to bf16 for the MXU path,
    # accumulate in f32, add f32 bias.
    o = jnp.dot(h.astype(w2_ref.dtype), w2_ref[...],
                preferred_element_type=jnp.float32) + b2_ref[...]
    o_ref[...] = o.astype(o_ref.dtype)


def _embed_batch(xf, params):
    """Runs the shared embedding MLP on a flattened (M, D) activation slab."""
    w1, b1, w2, b2 = params
    M, D = xf.shape
    H = w1.shape[1]
    E = w2.shape[1]

    # Padded shapes: M -> multiple of 16 (bf16 sublane packing),
    # E -> multiple of 128 (lane-dense, unmasked vst on the output).
    Mp = _round_up(M, 16)
    Ep = _round_up(E, 128)

    # bf16 activations/weights (halves HBM traffic, native MXU path);
    # biases stay f32 and are added to the f32 accumulator in-kernel.
    x_bf = jnp.pad(xf.astype(jnp.bfloat16), ((0, Mp - M), (0, 0)))
    w1_bf = w1.astype(jnp.bfloat16)
    w2_bf = jnp.pad(w2.astype(jnp.bfloat16), ((0, 0), (0, Ep - E)))
    b2_p = jnp.pad(b2, ((0, 0), (0, Ep - E)))

    flops = 2 * Mp * D * H + 2 * Mp * H * Ep
    bytes_accessed = (x_bf.size * 2 + w1_bf.size * 2 + b1.size * 4
                      + w2_bf.size * 2 + b2_p.size * 4 + Mp * Ep * 4)

    vmem = pl.BlockSpec(memory_space=pltpu.MemorySpace.VMEM)
    out = pl.pallas_call(
        _embedding_mlp_kernel,
        out_shape=jax.ShapeDtypeStruct((Mp, Ep), jnp.float32),
        # Single invocation, no grid: the whole problem is resident in VMEM
        # once — no per-step overhead, no weight re-DMA.
        in_specs=[vmem, vmem, vmem, vmem, vmem],
        out_specs=vmem,
        cost_estimate=pl.CostEstimate(flops=flops, transcendentals=0,
                                      bytes_accessed=bytes_accessed),
    )(x_bf, w1_bf, b1, w2_bf, b2_p)

    return out[:M, :E]


def triplet_net(x1, x2, x3, params):
    """Applies the shared embedding net to (x1, x2, x3). Inputs are NCHW."""
    w1 = params[0]
    B = x1.shape[0]
    D = w1.shape[0]

    # Flatten NCHW -> (B, D); contiguous row-major flatten == torch x.view(B, -1).
    # Build one aligned (3B, D) slab in the wrapper (tiny) so the kernel sees
    # a single contiguous ref — no in-kernel sublane-misaligned concatenate.
    xf = jnp.concatenate(
        [x1.reshape(B, D), x2.reshape(B, D), x3.reshape(B, D)], axis=0)

    out = _embed_batch(xf, params)                     # (3B, E)
    return out[:B], out[B:2 * B], out[2 * B:]


def get_embedding(x, params):
    """TripletNet.get_embedding equivalent: single branch, no redundant work."""
    B = x.shape[0]
    D = params[0].shape[0]
    return _embed_batch(x.reshape(B, D), params)


def init_params(key, D, H, E):
    """Deterministic synthetic parameters for the embedding MLP."""
    k1, k2, k3, k4 = jax.random.split(key, 4)
    w1 = jax.random.normal(k1, (D, H), jnp.float32) * 0.02
    b1 = jax.random.normal(k2, (1, H), jnp.float32) * 0.01
    w2 = jax.random.normal(k3, (H, E), jnp.float32) * 0.02
    b2 = jax.random.normal(k4, (1, E), jnp.float32) * 0.01
    return (w1, b1, w2, b2)


def _reference(x1, x2, x3, params):
    """Plain-JAX f32 reference of the same forward, for a correctness check."""
    w1, b1, w2, b2 = params

    def emb(x):
        xf = x.reshape(x.shape[0], -1).astype(jnp.float32)
        h = jnp.maximum(xf @ w1 + b1, 0.0)
        return h @ w2 + b2

    return emb(x1), emb(x2), emb(x3)


if __name__ == "__main__":
    # Small shapes: batch=2, channels=4, spatial=16x16 -> D = 4*16*16 = 1024
    B, C, Himg, Wimg = 2, 4, 16, 16
    D = C * Himg * Wimg
    HID, EMB = 128, 32

    key = jax.random.PRNGKey(0)
    kx1, kx2, kx3, kp = jax.random.split(key, 4)
    x1 = jax.random.normal(kx1, (B, C, Himg, Wimg), jnp.float32)
    x2 = jax.random.normal(kx2, (B, C, Himg, Wimg), jnp.float32)
    x3 = jax.random.normal(kx3, (B, C, Himg, Wimg), jnp.float32)
    params = init_params(kp, D, HID, EMB)

    o1, o2, o3 = triplet_net(x1, x2, x3, params)
    jax.block_until_ready((o1, o2, o3))

    # Single-branch entry point (get_embedding) — one pass, no 3x redundancy.
    e1 = get_embedding(x1, params)
    jax.block_until_ready(e1)

    r1, r2, r3 = _reference(x1, x2, x3, params)
    assert o1.shape == (B, EMB) and o2.shape == (B, EMB) and o3.shape == (B, EMB)
    # bf16 inputs/weights with f32 accumulation -> ~1% relative error vs f32.
    assert jnp.allclose(o1, r1, atol=3e-2, rtol=3e-2)
    assert jnp.allclose(o2, r2, atol=3e-2, rtol=3e-2)
    assert jnp.allclose(o3, r3, atol=3e-2, rtol=3e-2)
    assert jnp.allclose(e1, o1, atol=3e-2, rtol=3e-2)

    print("KERNEL_OK")
</pallas_src>

<mosaic_0001>
module attributes {stable_mosaic.version = 11 : i64} {
  func.func @_embedding_mlp_kernel(%arg0: memref<16x1024xbf16, #tpu.memory_space<vmem>>, %arg1: memref<1024x128xbf16, #tpu.memory_space<vmem>>, %arg2: memref<1x128xf32, #tpu.memory_space<vmem>>, %arg3: memref<128x128xbf16, #tpu.memory_space<vmem>>, %arg4: memref<1x128xf32, #tpu.memory_space<vmem>>, %arg5: memref<16x128xf32, #tpu.memory_space<vmem>>) attributes {dimension_semantics = [], scalar_prefetch = 0 : i64, scratch_operands = 0 : i64, tpu.core_type = #tpu.core_type<tc>} {
    %c0 = arith.constant 0 : index
    %c0_0 = arith.constant 0 : index
    %0 = vector.load %arg0[%c0, %c0_0] : memref<16x1024xbf16, #tpu.memory_space<vmem>>, vector<16x1024xbf16>
    %c0_1 = arith.constant 0 : index
    %c0_2 = arith.constant 0 : index
    %1 = vector.load %arg1[%c0_1, %c0_2] : memref<1024x128xbf16, #tpu.memory_space<vmem>>, vector<1024x128xbf16>
    %cst = arith.constant dense<0.000000e+00> : vector<16x128xf32>
    %2 = tpu.matmul %0, %1, %cst {dimension_numbers = #tpu.dot_dimension_numbers<[1], [0], [0], [1], [0, 0, 1, 1], [], []>} : vector<16x1024xbf16>, vector<1024x128xbf16>, vector<16x128xf32> -> vector<16x128xf32>
    %c0_3 = arith.constant 0 : index
    %c0_4 = arith.constant 0 : index
    %3 = vector.load %arg2[%c0_3, %c0_4] : memref<1x128xf32, #tpu.memory_space<vmem>>, vector<1x128xf32>
    %4 = vector.broadcast %3 : vector<1x128xf32> to vector<16x128xf32>
    %5 = arith.addf %2, %4 : vector<16x128xf32>
    %cst_5 = arith.constant 0.000000e+00 : f32
    %6 = vector.broadcast %cst_5 : f32 to vector<16x128xf32>
    %7 = arith.maximumf %5, %6 : vector<16x128xf32>
    %8 = arith.truncf %7 : vector<16x128xf32> to vector<16x128xbf16>
    %c0_6 = arith.constant 0 : index
    %c0_7 = arith.constant 0 : index
    %9 = vector.load %arg3[%c0_6, %c0_7] : memref<128x128xbf16, #tpu.memory_space<vmem>>, vector<128x128xbf16>
    %cst_8 = arith.constant dense<0.000000e+00> : vector<16x128xf32>
    %10 = tpu.matmul %8, %9, %cst_8 {dimension_numbers = #tpu.dot_dimension_numbers<[1], [0], [0], [1], [0, 0, 1, 1], [], []>} : vector<16x128xbf16>, vector<128x128xbf16>, vector<16x128xf32> -> vector<16x128xf32>
    %c0_9 = arith.constant 0 : index
    %c0_10 = arith.constant 0 : index
    %11 = vector.load %arg4[%c0_9, %c0_10] : memref<1x128xf32, #tpu.memory_space<vmem>>, vector<1x128xf32>
    %12 = vector.broadcast %11 : vector<1x128xf32> to vector<16x128xf32>
    %13 = arith.addf %10, %12 : vector<16x128xf32>
    %c0_11 = arith.constant 0 : index
    %c0_12 = arith.constant 0 : index
    %14 = vector.load %arg5[%c0_11, %c0_12] : memref<16x128xf32, #tpu.memory_space<vmem>>, vector<16x128xf32>
    tpu.vector_store %arg5[%c0_11, %c0_12], %13 {strides = array<i32>} : memref<16x128xf32, #tpu.memory_space<vmem>>, vector<16x128xf32>,
    return
  }
}

</mosaic_0001>

<bundles_post_ra>
// kernel: tpu_custom_call.1
= control target key start
LH: loop header
LB: loop body
LE: loop exit
PB: predicated region body
PF: predicated region fallthrough
CT: control target
= control target key end

     0   :  { %10 = vsyncpa [#allocation3], 0  ;;  %s1408_s0 = inlined_call_operand.hbm [shape: bf16[16,1024], index: 0, kind: input, shape index: {}]   ;;  %s1409_s1 = inlined_call_operand.hbm [shape: bf16[1024,128], index: 1, kind: input, shape index: {}]   ;;  %s1410_s2 = inlined_call_operand.vmem [shape: f32[1,128], index: 2, kind: input, shape index: {}]   ;;  %s1411_s3 = inlined_call_operand.hbm [shape: bf16[128,128], index: 3, kind: input, shape index: {}]   ;;  %s1412_s4 = inlined_call_operand.vmem [shape: f32[1,128], index: 4, kind: input, shape index: {}]   ;;  %s1413_s5 = inlined_call_operand.hbm [shape: f32[16,128], index: 5, kind: output, shape index: {}]  }
   0x1   :  { %11 = vsyncpa [#allocation6], 0 }
   0x2   :  { %12 = vsyncpa [#allocation4], 0  ;;  %s1306_s18 = smov [#allocation5]   ;;  %s1212_s22 = scalar_lea.hbm %s1409_s1, 8192 }
   0x3   :  { %s30_s19 = sshll.u32 %s1306_s18, 4  ;;  %p1213_p0 = scmp.ne.s32.totalorder %s1409_s1, %s1212_s22  ;;  %s31_s19 = int_to_ptr.vmem [resolvable:$true] %s30_s19 }
   0x4   :  { %p1216_p1 = scmp.lt.u32.totalorder %s1212_s22, %s1409_s1 }
   0x6   :  { %p1218_p2 = pnand %p1216_p1, %p1213_p0 }
   0x8   :  { %1221 = shalt.err (!%p1218_p2)
}
   0x9   :  { %s1222_s27 = scalar_lea.vmem %s31_s19, 8192  ;;  %p1227_p4 = scmp.lt.s32.totalorder %s31_s19, %s31_s19 }
   0xa   :  { %p1223_p3 = scmp.ne.s32.totalorder %s31_s19, %s1222_s27  ;;  %p1228_p5 = scmp.lt.s32.totalorder %s1222_s27, %s1222_s27 }
   0xc   :  { %p1229_p6 = por %p1228_p5, %p1227_p4 }
   0xe   :  { %p1230_p7 = pnand %p1229_p6, %p1223_p3 }
  0x10   :  { %1233 = shalt.err (!%p1230_p7)
}
  0x11   :  { %s1307_s28 = smov 64   ;;  %s1308_s29 = smov 4  }
  0x12   :  { %36 = dma.hbm_to_vmem [thread:$0]  %s1409_s1, 8192, %s31_s19, [#allocation6], %s1307_s28, %s1307_s28, %s1308_s29  }
  0x13   :  { %s1309_s7 = smov [#allocation2]   ;;  %s1234_s11 = scalar_lea.hbm %s1408_s0, 1024 }
  0x14   :  { %s18_s8 = sshll.u32 %s1309_s7, 4  ;;  %p1235_p8 = scmp.ne.s32.totalorder %s1408_s0, %s1234_s11  ;;  %s19_s8 = int_to_ptr.vmem [resolvable:$true] %s18_s8 }
  0x15   :  { %p1238_p9 = scmp.lt.u32.totalorder %s1234_s11, %s1408_s0 }
  0x17   :  { %p1240_p10 = pnand %p1238_p9, %p1235_p8 }
  0x19   :  { %1243 = shalt.err (!%p1240_p10)
}
  0x1a   :  { %s1244_s16 = scalar_lea.vmem %s19_s8, 1024  ;;  %p1249_p12 = scmp.lt.s32.totalorder %s19_s8, %s19_s8 }
  0x1b   :  { %p1245_p11 = scmp.ne.s32.totalorder %s19_s8, %s1244_s16  ;;  %p1250_p13 = scmp.lt.s32.totalorder %s1244_s16, %s1244_s16 }
  0x1d   :  { %p1251_p0 = por %p1250_p13, %p1249_p12 }
  0x1f   :  { %p1252_p1 = pnand %p1251_p0, %p1245_p11 }
  0x21   :  { %1255 = shalt.err (!%p1252_p1)
}
  0x22   :  { %s1310_s1 = smov 512   ;;  %s1311_s17 = smov 32  }
  0x23   :  { %24 = dma.hbm_to_vmem [thread:$0]  %s1408_s0, 1024, %s19_s8, [#allocation3], %s1310_s1, %s1310_s1, %s1311_s17  }
  0x24   :  { %s1312_s20 = smov [#allocation7]   ;;  %s1256_s24 = scalar_lea.hbm %s1411_s3, 1024 }
  0x25   :  { %s44_s21 = sshll.u32 %s1312_s20, 4  ;;  %p1257_p2 = scmp.ne.s32.totalorder %s1411_s3, %s1256_s24  ;;  %s45_s21 = int_to_ptr.vmem [resolvable:$true] %s44_s21 }
  0x26   :  { %p1260_p3 = scmp.lt.u32.totalorder %s1256_s24, %s1411_s3 }
  0x28   :  { %p1262_p4 = pnand %p1260_p3, %p1257_p2 }
  0x2a   :  { %1265 = shalt.err (!%p1262_p4)
}
  0x2b   :  { %s1266_s6 = scalar_lea.vmem %s45_s21, 1024  ;;  %p1271_p6 = scmp.lt.s32.totalorder %s45_s21, %s45_s21 }
  0x2c   :  { %p1267_p5 = scmp.ne.s32.totalorder %s45_s21, %s1266_s6  ;;  %p1272_p7 = scmp.lt.s32.totalorder %s1266_s6, %s1266_s6 }
  0x2e   :  { %p1273_p8 = por %p1272_p7, %p1271_p6 }
  0x30   :  { %p1274_p9 = pnand %p1273_p8, %p1267_p5 }
  0x32   :  { %1277 = shalt.err (!%p1274_p9)
}
  0x33   :  { %50 = dma.hbm_to_vmem [thread:$0]  %s1411_s3, 1024, %s45_s21, [#allocation6], %s1307_s28, %s1307_s28, %s1308_s29  }
  0x34   :  { %1300 = dma.done.wait [#allocation3], 1024  }
  0x35   :  { %1301 = vsyncadd [#allocation3], 4294966272 }
  0x36   :  { %1302 = dma.done.wait [#allocation6], 9216  }
  0x37   :  { %1303 = vsyncadd [#allocation6], 4294958080  ;;  %v1140_v0 = vld [vmem:[#allocation5 + $0x40] sm:$0xff]   ;;  %v1144_v4 = vld [vmem:[#allocation5 + $0x48] sm:$0xff]   ;;  %vm1314_vm0 = vmmov 0   ;;  %s1315_s8 = smov [#allocation8]  }
  0x38   :  { %v1141_v1 = vld [vmem:[#allocation5 + $0xc0] sm:$0xff]   ;;  %1011 = vmatprep.subr.bf16.mxu0 %v1140_v0  ;;  %v1145_v5 = vld [vmem:[#allocation5 + $0xc8] sm:$0xff]   ;;  %v1148_v8 = vld [vmem:[#allocation5 + $0x50] sm:$0xff]   ;;  %s916_s9 = sshll.u32 %s1315_s8, 4  ;;  %s917_s9 = int_to_ptr.vmem [resolvable:$true] %s916_s9 }
  0x39   :  { %v1142_v2 = vld [vmem:[#allocation5] sm:$0xff]   ;;  %1033 = vmatprep.subr.bf16.mxu1 %v1141_v1  ;;  %v1146_v6 = vld [vmem:[#allocation5 + $0x8] sm:$0xff]   ;;  %v1149_v9 = vld [vmem:[#allocation5 + $0xd0] sm:$0xff]   ;;  %s1278_s10 = scalar_lea.vmem %s917_s9, 256  ;;  %p1283_p11 = scmp.lt.s32.totalorder %s917_s9, %s917_s9 }
  0x3a   :  { %v1143_v3 = vld [vmem:[#allocation5 + $0x80] sm:$0xff]   ;;  %1012 = vmatpush3.bf16.msra.mxu0 %v1142_v2  ;;  %v1147_v7 = vld [vmem:[#allocation5 + $0x88] sm:$0xff]   ;;  %v1150_v10 = vld [vmem:[#allocation5 + $0x10] sm:$0xff]   ;;  %p1279_p10 = scmp.ne.s32.totalorder %s917_s9, %s1278_s10  ;;  %p1284_p12 = scmp.lt.s32.totalorder %s1278_s10, %s1278_s10 }
  0x3b   :  { %1034 = vmatpush3.bf16.msra.mxu1 %v1143_v3  ;;  %1013 = vmatprep.subr.bf16.mxu0 %v1144_v4  ;;  %v1151_v11 = vld [vmem:[#allocation5 + $0x90] sm:$0xff]   ;;  %v1152_v12 = vld [vmem:[#allocation5 + $0x58] sm:$0xff]   ;;  %v1156_v16 = vld [vmem:[#allocation5 + $0x60] sm:$0xff]  }
  0x3c   :  { %1035 = vmatprep.subr.bf16.mxu1 %v1145_v5  ;;  %v1153_v13 = vld [vmem:[#allocation5 + $0xd8] sm:$0xff]   ;;  %v1157_v17 = vld [vmem:[#allocation5 + $0xe0] sm:$0xff]   ;;  %v1160_v20 = vld [vmem:[#allocation5 + $0x68] sm:$0xff]   ;;  %p1285_p13 = por %p1284_p12, %p1283_p11 }
  0x3d   :  { %v1154_v14 = vld [vmem:[#allocation5 + $0x18] sm:$0xff]   ;;  %v1158_v18 = vld [vmem:[#allocation5 + $0x20] sm:$0xff]   ;;  %v1161_v21 = vld [vmem:[#allocation5 + $0xe8] sm:$0xff]  }
  0x3e   :  { %1014 = vmatpush3.bf16.msra.mxu0 %v1146_v6  ;;  %v1155_v15 = vld [vmem:[#allocation5 + $0x98] sm:$0xff]   ;;  %v1159_v19 = vld [vmem:[#allocation5 + $0xa0] sm:$0xff]   ;;  %v1162_v22 = vld [vmem:[#allocation5 + $0x28] sm:$0xff]   ;;  %p1286_p0 = pnand %p1285_p13, %p1279_p10 }
  0x3f   :  { %1036 = vmatpush3.bf16.msra.mxu1 %v1147_v7  ;;  %1015 = vmatprep.subr.bf16.mxu0 %v1148_v8  ;;  %v1163_v23 = vld [vmem:[#allocation5 + $0xa8] sm:$0xff]   ;;  %v1164_v24 = vld [vmem:[#allocation5 + $0x70] sm:$0xff]   ;;  %v1168_v28 = vld [vmem:[#allocation5 + $0x78] sm:$0xff]  }
  0x40   :  { %1037 = vmatprep.subr.bf16.mxu1 %v1149_v9  ;;  %v1165_v25 = vld [vmem:[#allocation5 + $0xf0] sm:$0xff]   ;;  %v1169_v29 = vld [vmem:[#allocation5 + $0xf8] sm:$0xff]   ;;  %v63_v32 = vld [vmem:[#allocation2] sm:$0xff] }
  0x41   :  { %v1166_v26 = vld [vmem:[#allocation5 + $0x30] sm:$0xff]   ;;  %v1170_v30 = vld [vmem:[#allocation5 + $0x38] sm:$0xff]   ;;  %v67_v33 = vld [vmem:[#allocation2 + $0x20] sm:$0xff] }
  0x42   :  { %1016 = vmatpush3.bf16.msra.mxu0 %v1150_v10  ;;  %v1167_v27 = vld [vmem:[#allocation5 + $0xb0] sm:$0xff]   ;;  %v1171_v31 = vld [vmem:[#allocation5 + $0xb8] sm:$0xff]   ;;  %v64_v34 = vld [vmem:[#allocation2 + $0x8] sm:$0xff]  ;;  %v930_v35 = vcombine.low %v63_v32, %v67_v33  ;;  %v931_v36 = vcombine.high %v63_v32, %v67_v33 }
  0x43   :  { %1038 = vmatpush3.bf16.msra.mxu1 %v1151_v11  ;;  %1017 = vmatprep.subr.bf16.mxu0 %v1152_v12  ;;  %v68_v37 = vld [vmem:[#allocation2 + $0x28] sm:$0xff]  ;;  %v1172_v40 = vld [vmem:[#allocation5 + $0x140] sm:$0xff]   ;;  %v1180_v48 = vld [vmem:[#allocation5 + $0x150] sm:$0xff]  }
  0x44   :  { %1039 = vmatprep.subr.bf16.mxu1 %v1153_v13  ;;  %v932_v38 = vcombine.low %v64_v34, %v68_v37  ;;  %v933_v39 = vcombine.high %v64_v34, %v68_v37  ;;  %662 = vmatprep.mubr.bf16.mxu0 %v931_v36  ;;  %v1173_v41 = vld [vmem:[#allocation5 + $0x1c0] sm:$0xff]   ;;  %v1176_v44 = vld [vmem:[#allocation5 + $0x148] sm:$0xff]   ;;  %v1181_v49 = vld [vmem:[#allocation5 + $0x1d0] sm:$0xff]  }
  0x45   :  { %v1174_v42 = vld [vmem:[#allocation5 + $0x100] sm:$0xff]   ;;  %v1177_v45 = vld [vmem:[#allocation5 + $0x1c8] sm:$0xff]   ;;  %v1182_v50 = vld [vmem:[#allocation5 + $0x110] sm:$0xff]  }
  0x46   :  { %1018 = vmatpush3.bf16.msra.mxu0 %v1154_v14  ;;  %703 = vmatprep.mubr.bf16.mxu1 %v933_v39  ;;  %v1175_v43 = vld [vmem:[#allocation5 + $0x180] sm:$0xff]   ;;  %v1178_v46 = vld [vmem:[#allocation5 + $0x108] sm:$0xff]   ;;  %v1183_v51 = vld [vmem:[#allocation5 + $0x190] sm:$0xff]  }
  0x47   :  { %1040 = vmatpush3.bf16.msra.mxu1 %v1155_v15  ;;  %1019 = vmatprep.subr.bf16.mxu0 %v1156_v16  ;;  %v1179_v47 = vld [vmem:[#allocation5 + $0x188] sm:$0xff]   ;;  %v1184_v52 = vld [vmem:[#allocation5 + $0x158] sm:$0xff]   ;;  %v1188_v56 = vld [vmem:[#allocation5 + $0x160] sm:$0xff]  }
  0x48   :  { %1041 = vmatprep.subr.bf16.mxu1 %v1157_v17  ;;  %v1185_v53 = vld [vmem:[#allocation5 + $0x1d8] sm:$0xff]   ;;  %v1189_v57 = vld [vmem:[#allocation5 + $0x1e0] sm:$0xff]   ;;  %v1192_v60 = vld [vmem:[#allocation5 + $0x168] sm:$0xff]   ;;  %v1313_v17 = vmov 0.0  }
  0x49   :  { %v1186_v54 = vld [vmem:[#allocation5 + $0x118] sm:$0xff]   ;;  %v1190_v58 = vld [vmem:[#allocation5 + $0x120] sm:$0xff]   ;;  %v1193_v61 = vld [vmem:[#allocation5 + $0x1e8] sm:$0xff]  }
  0x4a   :  { %1020 = vmatpush3.bf16.msra.mxu0 %v1158_v18  ;;  %v1187_v55 = vld [vmem:[#allocation5 + $0x198] sm:$0xff]   ;;  %v1191_v59 = vld [vmem:[#allocation5 + $0x1a0] sm:$0xff]   ;;  %v1194_v62 = vld [vmem:[#allocation5 + $0x128] sm:$0xff]  }
  0x4b   :  { %1042 = vmatpush3.bf16.msra.mxu1 %v1159_v19  ;;  %1021 = vmatprep.subr.bf16.mxu0 %v1160_v20  ;;  %v1195_v63 = vld [vmem:[#allocation5 + $0x1a8] sm:$0xff]   ;;  %v1196_v0 = vld [vmem:[#allocation5 + $0x170] sm:$0xff]   ;;  %v1200_v4 = vld [vmem:[#allocation5 + $0x178] sm:$0xff]  }
  0x4c   :  { %1043 = vmatprep.subr.bf16.mxu1 %v1161_v21  ;;  %v1197_v1 = vld [vmem:[#allocation5 + $0x1f0] sm:$0xff]   ;;  %v1201_v5 = vld [vmem:[#allocation5 + $0x1f8] sm:$0xff]   ;;  %v1204_v16 = vld [vmem:[#allocation7] sm:$0xff]  }
  0x4d   :  { %v1198_v2 = vld [vmem:[#allocation5 + $0x130] sm:$0xff]   ;;  %v1202_v6 = vld [vmem:[#allocation5 + $0x138] sm:$0xff]   ;;  %v1205_v18 = vld [vmem:[#allocation7 + $0x8] sm:$0xff]  }
  0x4e   :  { %1022 = vmatpush3.bf16.msra.mxu0 %v1162_v22  ;;  %v1199_v3 = vld [vmem:[#allocation5 + $0x1b0] sm:$0xff]   ;;  %v1203_v7 = vld [vmem:[#allocation5 + $0x1b8] sm:$0xff]   ;;  %v1208_v21 = vld [vmem:[#allocation7 + $0x20] sm:$0xff]  }
  0x4f   :  { %1044 = vmatpush3.bf16.msra.mxu1 %v1163_v23  ;;  %1023 = vmatprep.subr.bf16.mxu0 %v1164_v24  ;;  %v65_v8 = vld [vmem:[#allocation2 + $0x10] sm:$0xff]  ;;  %v66_v12 = vld [vmem:[#allocation2 + $0x18] sm:$0xff]  ;;  %v1209_v22 = vld [vmem:[#allocation7 + $0x28] sm:$0xff]  }
  0x50   :  { %1045 = vmatprep.subr.bf16.mxu1 %v1165_v25  ;;  %v69_v9 = vld [vmem:[#allocation2 + $0x30] sm:$0xff]  ;;  %v70_v13 = vld [vmem:[#allocation2 + $0x38] sm:$0xff] }
  0x51   :  { %v934_v10 = vcombine.low %v65_v8, %v69_v9  ;;  %v935_v11 = vcombine.high %v65_v8, %v69_v9  ;;  %v936_v14 = vcombine.low %v66_v12, %v70_v13  ;;  %v937_v15 = vcombine.high %v66_v12, %v70_v13  ;;  %v1206_v19 = vld [vmem:[#allocation7 + $0x10] sm:$0xff]   ;;  %v1207_v20 = vld [vmem:[#allocation7 + $0x18] sm:$0xff]  }
  0x52   :  { %1024 = vmatpush3.bf16.msra.mxu0 %v1166_v26  ;;  %v1210_v23 = vld [vmem:[#allocation7 + $0x30] sm:$0xff]   ;;  %v1211_v24 = vld [vmem:[#allocation7 + $0x38] sm:$0xff]  }
  0x53   :  { %1046 = vmatpush3.bf16.msra.mxu1 %v1167_v27  ;;  %1025 = vmatprep.subr.bf16.mxu0 %v1168_v28  ;;  %v929_v27 = vld [vmem:[%s1410_s2] ss:$0 sm:$0xff] }
  0x54   :  { %1047 = vmatprep.subr.bf16.mxu1 %v1169_v29 }
  0x56   :  { %1026 = vmatpush3.bf16.msra.mxu0 %v1170_v30 }
  0x57   :  { %1048 = vmatpush3.bf16.msra.mxu1 %v1171_v31  ;;  %1055 = vmatprep.subr.bf16.mxu0 %v1172_v40 }
  0x58   :  { %1077 = vmatprep.subr.bf16.mxu1 %v1173_v41 }
  0x59   :  { %663 = vmatmul.mubr.bf16.vlgmr.msra.gmra.mrb[0].mxu0 %v930_v35 }
  0x5a   :  { %704 = vmatmul.mubr.bf16.vlgmr.msra.gmra.mrb[0].mxu1 %v932_v38  ;;  %1056 = vmatpush3.bf16.msra.mxu0 %v1174_v42 }
  0x5b   :  { %1078 = vmatpush3.bf16.msra.mxu1 %v1175_v43  ;;  %1057 = vmatprep.subr.bf16.mxu0 %v1176_v44 }
  0x5c   :  { %1079 = vmatprep.subr.bf16.mxu1 %v1177_v45  ;;  %744 = vmatprep.mubr.bf16.mxu0 %v935_v11 }
  0x5d   :  { %785 = vmatprep.mubr.bf16.mxu1 %v937_v15 }
  0x5e   :  { %1058 = vmatpush3.bf16.msra.mxu0 %v1178_v46 }
  0x5f   :  { %1080 = vmatpush3.bf16.msra.mxu1 %v1179_v47  ;;  %1059 = vmatprep.subr.bf16.mxu0 %v1180_v48 }
  0x60   :  { %1081 = vmatprep.subr.bf16.mxu1 %v1181_v49 }
  0x62   :  { %1060 = vmatpush3.bf16.msra.mxu0 %v1182_v50 }
  0x63   :  { %1082 = vmatpush3.bf16.msra.mxu1 %v1183_v51  ;;  %1061 = vmatprep.subr.bf16.mxu0 %v1184_v52 }
  0x64   :  { %1083 = vmatprep.subr.bf16.mxu1 %v1185_v53 }
  0x66   :  { %1062 = vmatpush3.bf16.msra.mxu0 %v1186_v54 }
  0x67   :  { %1084 = vmatpush3.bf16.msra.mxu1 %v1187_v55  ;;  %1063 = vmatprep.subr.bf16.mxu0 %v1188_v56 }
  0x68   :  { %1085 = vmatprep.subr.bf16.mxu1 %v1189_v57 }
  0x6a   :  { %1064 = vmatpush3.bf16.msra.mxu0 %v1190_v58 }
  0x6b   :  { %1086 = vmatpush3.bf16.msra.mxu1 %v1191_v59  ;;  %1065 = vmatprep.subr.bf16.mxu0 %v1192_v60 }
  0x6c   :  { %1087 = vmatprep.subr.bf16.mxu1 %v1193_v61  ;;  %v1002_v61 = vld [vmem:[%s1412_s4] ss:$0 sm:$0xff] }
  0x6e   :  { %1066 = vmatpush3.bf16.msra.mxu0 %v1194_v62 }
  0x6f   :  { %1088 = vmatpush3.bf16.msra.mxu1 %v1195_v63  ;;  %1067 = vmatprep.subr.bf16.mxu0 %v1196_v0 }
  0x70   :  { %1089 = vmatprep.subr.bf16.mxu1 %v1197_v1 }
  0x72   :  { %1068 = vmatpush3.bf16.msra.mxu0 %v1198_v2 }
  0x73   :  { %1090 = vmatpush3.bf16.msra.mxu1 %v1199_v3  ;;  %1069 = vmatprep.subr.bf16.mxu0 %v1200_v4 }
  0x74   :  { %1091 = vmatprep.subr.bf16.mxu1 %v1201_v5 }
  0x76   :  { %1070 = vmatpush3.bf16.msra.mxu0 %v1202_v6 }
  0x77   :  { %1092 = vmatpush3.bf16.msra.mxu1 %v1203_v7  ;;  %1108 = vmatprep.subr.bf16.mxu0 %v1313_v17 }
  0x79   :  { %745 = vmatmul.mubr.bf16.vlgmr.msra.gmra.mrb[4].mxu0 %v934_v10 }
  0x7a   :  { %786 = vmatmul.mubr.bf16.vlgmr.msra.gmra.mrb[4].mxu1 %v936_v14  ;;  %1109 = vmatpush3.bf16.msra.mxu0 %v1204_v16 }
  0x7b   :  { %1110 = vmatprep.subr.bf16.mxu0 %v1313_v17  ;;  %1124 = vmatprep.mubr.msk.bf16.mxu0 %vm1314_vm0, %v1313_v17 }
  0x7e   :  { %1111 = vmatpush3.bf16.msra.mxu0 %v1205_v18 }
  0x7f   :  { %1112 = vmatprep.subr.bf16.mxu0 %v1313_v17 }
  0x82   :  { %1113 = vmatpush3.bf16.msra.mxu0 %v1206_v19 }
  0x83   :  { %1114 = vmatprep.subr.bf16.mxu0 %v1313_v17 }
  0x86   :  { %1115 = vmatpush3.bf16.msra.mxu0 %v1207_v20 }
  0x87   :  { %1116 = vmatprep.subr.bf16.mxu0 %v1313_v17 }
  0x8a   :  { %1117 = vmatpush3.bf16.msra.mxu0 %v1208_v21 }
  0x8b   :  { %1118 = vmatprep.subr.bf16.mxu0 %v1313_v17 }
  0x8e   :  { %1119 = vmatpush3.bf16.msra.mxu0 %v1209_v22 }
  0x8f   :  { %1120 = vmatprep.subr.bf16.mxu0 %v1313_v17 }
  0x92   :  { %1121 = vmatpush3.bf16.msra.mxu0 %v1210_v23 }
  0x93   :  { %1122 = vmatprep.subr.bf16.mxu0 %v1313_v17 }
  0x96   :  { %1123 = vmatpush3.bf16.msra.mxu0 %v1211_v24 }
 0x12c   :  { %v1027_v25 = vpop.f32.mrb[0].mxu0 }
 0x12d   :  { %v1049_v26 = vpop.f32.mrb[0].mxu1  ;;  %v1028_v28 = vpop.f32.mrb[1].mxu0 }
 0x12e   :  { %v1029_v29 = vadd.f32 %v1028_v28, %v1027_v25  ;;  %v1050_v30 = vpop.f32.mrb[1].mxu1  ;;  %v1030_v31 = vpop.f32.mrb[2].mxu0 }
 0x12f   :  { %v1051_v32 = vadd.f32 %v1050_v30, %v1049_v26  ;;  %v1052_v33 = vpop.f32.mrb[2].mxu1  ;;  %v1031_v34 = vpop.f32.mrb[3].mxu0 }
 0x130   :  { %v665_v35 = vadd.f32 %v1029_v29, %v929_v27  ;;  %v1032_v36 = vadd.f32 %v1031_v34, %v1030_v31  ;;  %v1053_v37 = vpop.f32.mrb[3].mxu1 }
 0x131   :  { %v1054_v38 = vadd.f32 %v1053_v37, %v1052_v33 }
 0x132   :  { %v706_v39 = vadd.f32 %v1051_v32, %v665_v35  ;;  %v668_v40 = vadd.f32 %v1032_v36, %v929_v27 }
 0x134   :  { %v709_v41 = vadd.f32 %v1054_v38, %v668_v40 }
 0x14c   :  { %v1071_v42 = vpop.f32.mrb[4].mxu0 }
 0x14d   :  { %v1093_v43 = vpop.f32.mrb[4].mxu1  ;;  %v1072_v44 = vpop.f32.mrb[5].mxu0 }
 0x14e   :  { %v1073_v45 = vadd.f32 %v1072_v44, %v1071_v42  ;;  %v1094_v46 = vpop.f32.mrb[5].mxu1  ;;  %v1074_v47 = vpop.f32.mrb[6].mxu0 }
 0x14f   :  { %v1095_v48 = vadd.f32 %v1094_v46, %v1093_v43  ;;  %v1096_v49 = vpop.f32.mrb[6].mxu1  ;;  %v1075_v50 = vpop.f32.mrb[7].mxu0 }
 0x150   :  { %v747_v51 = vadd.f32 %v1073_v45, %v706_v39  ;;  %v1076_v52 = vadd.f32 %v1075_v50, %v1074_v47  ;;  %v1097_v53 = vpop.f32.mrb[7].mxu1 }
 0x151   :  { %v1098_v54 = vadd.f32 %v1097_v53, %v1096_v49 }
 0x152   :  { %v788_v55 = vadd.f32 %v1095_v48, %v747_v51  ;;  %v750_v56 = vadd.f32 %v1076_v52, %v709_v41 }
 0x154   :  { %v791_v57 = vadd.f32 %v1098_v54, %v750_v56  ;;  %v794_v58 = vmax.f32 %v788_v55, 0.0 }
 0x156   :  { %v795_v59 = vmax.f32 %v791_v57, 0.0 }
 0x158   :  { %v796_v60 = vpack.c.bf16 %v795_v59, %v794_v58 }
 0x15a   :  { %1125 = vmatmul.mubr.bf16.vlgmr.msra.gmra.mrb[8].mxu0 %v796_v60 }
 0x22d   :  { %v902_v62 = vpop.f32.mrb[8].mxu0 }
 0x22e   :  { %v903_v63 = vadd.f32 %v1002_v61, %v902_v62  ;;  %v1126_v0 = vpop.f32.mrb[9].mxu0 }
 0x22f   :  { %v905_v1 = vpop.f32.mrb[10].mxu0 }
 0x230   :  { %909 = vst [vmem:[#allocation8] sm:$0xff] %v903_v63  ;;  %v906_v2 = vadd.f32 %v1002_v61, %v905_v1  ;;  %v1127_v3 = vpop.f32.mrb[11].mxu0 }
 0x232   :  { %910 = vst [vmem:[#allocation8 + $0x8] sm:$0xff] %v906_v2 }
 0x233   :  { %1289 = shalt.err (!%p1286_p0)
}
 0x234   :  { %s1290_s12 = scalar_lea.hbm %s1413_s5, 256 }
 0x235   :  { %p1291_p1 = scmp.ne.s32.totalorder %s1413_s5, %s1290_s12  ;;  %p1294_p2 = scmp.lt.u32.totalorder %s1290_s12, %s1413_s5 }
 0x237   :  { %p1296_p3 = pnand %p1294_p2, %p1291_p1 }
 0x239   :  { %1299 = shalt.err (!%p1296_p3)
}
 0x23a   :  { %s1316_s1 = smov 128   ;;  %s1317_s17 = smov 8  }
 0x23b   :  { %922 = dma.vmem_to_hbm [thread:$0]  %s917_s9, 256, %s1413_s5, [#allocation4], %s1316_s1, %s1316_s1, %s1317_s17  }
 0x23c   :  { %1304 = dma.done.wait [#allocation4], 256  }
 0x23d   :  { %1305 = vsyncadd [#allocation4], 4294967040 }
 0x23e   :  { %926 = vsyncpa [#allocation3], 1 }
 0x23f   :  { %927 = vsyncpa [#allocation6], 1 }
 0x240   :  { %928 = vsyncpa [#allocation4], 1 }

</bundles_post_ra>
